<compile_context>
chip_gen: v6e
topology: v6e:2x2x1
jax: 0.10.0
libtpu: 0.0.40
codegen_flags: <defaults>
</compile_context>

<pallas_src>
import functools

import jax
import jax.numpy as jnp
from jax.experimental import pallas as pl
from jax.experimental.pallas import tpu as pltpu

LEAKY_SLOPE = 0.01  # nn.LeakyReLU default negative_slope
BN_EPS = 1e-5


def _leaky_relu(x):
    return jnp.where(x >= 0, x, LEAKY_SLOPE * x)


def _block_kernel(x_ref, wf_ref, bf_ref, wg_ref, bg_ref, o_ref, *, use_bf16_matmul):
    # x_ref / o_ref: (1, 2, mid, t_hw).  Dim 1 holds the two channel halves; selecting
    # a half is a free leading-dim slab index.  Reading straight off the ref avoids a
    # full-tile VMEM temporary + half-tile copies that value-slicing would create.
    x1 = x_ref[0, 0, :, :].astype(jnp.float32)   # (mid, t_hw)
    x2 = x_ref[0, 1, :, :].astype(jnp.float32)   # (mid, t_hw)

    if use_bf16_matmul:
        # Large mid: bf16 operands + f32 MXU accumulation (~4x MXU throughput on
        # v6e/v7x once the contraction is big enough to matter).
        wf = wf_ref[...].astype(jnp.bfloat16)
        wg = wg_ref[...].astype(jnp.bfloat16)
        f = jnp.dot(wf, x2.astype(jnp.bfloat16), preferred_element_type=jnp.float32)
    else:
        # Small mid: HBM-bandwidth bound with a tiny contraction; keep f32 so the
        # additive-coupling numerics stay within 1e-5 of the reference.
        f = jnp.dot(wf_ref[...], x2, preferred_element_type=jnp.float32)

    # y1 = x1 + LeakyReLU(BN(Conv1x1(x2)))   (BN folded into wf/bf)
    y1 = x1 + _leaky_relu(f + bf_ref[...])

    if use_bf16_matmul:
        g = jnp.dot(wg, y1.astype(jnp.bfloat16), preferred_element_type=jnp.float32)
    else:
        g = jnp.dot(wg_ref[...], y1, preferred_element_type=jnp.float32)

    # y2 = x2 + LeakyReLU(BN(Conv1x1(y1)))   (BN folded into wg/bg)
    y2 = x2 + _leaky_relu(g + bg_ref[...])

    # Full (sublane, lane) slab stores: lane-dense, unmasked.
    o_ref[0, 0, :, :] = y1.astype(o_ref.dtype)
    o_ref[0, 1, :, :] = y2.astype(o_ref.dtype)


def _pick_tile_hw(hw, mid, n, tile_vmem_budget_bytes):
    """Lane-tile width: largest multiple of 128 fitting the VMEM budget.

    No requirement that it divide H*W (Pallas handles the partial tail block), and a
    best-effort even total step count so v7x's two TensorCores stay balanced.
    """
    if hw <= 128:
        return hw  # single full-extent tile (block dim == array dim is always legal)

    sub = ((mid + 7) // 8) * 8  # sublane-padded channel rows per half
    # Per-lane f32 bytes: double-buffered input (2 halves) + double-buffered output
    # (2 halves) + ~4 half-tile in-kernel temporaries (f, y1, g, y2).
    bytes_per_lane = (2 * 2 * 2 + 2 * 2 * 2 + 4) * sub * 4
    cap_lanes = max(128, (tile_vmem_budget_bytes // bytes_per_lane) // 128 * 128)

    t_hw = min(cap_lanes, pl.cdiv(hw, 128) * 128)

    # Best-effort megacore balance: prefer an even total number of grid steps
    # (v7x shards "parallel" grid axes across 2 TensorCores; no effect on v5e/v6e).
    if (n * pl.cdiv(hw, t_hw)) % 2 == 1:
        t = t_hw - 128
        while t >= 128 and t * 4 >= t_hw * 3:  # shrink the tile by at most ~25%
            if (n * pl.cdiv(hw, t)) % 2 == 0:
                t_hw = t
                break
            t -= 128
    return t_hw


def block_forward_pallas(x_nchw, params, *, tile_vmem_budget_bytes=10 * 1024 * 1024):
    """Forward pass of Block (reverse=False). x_nchw: (N, C, H, W) float32."""
    n, c, h, w = x_nchw.shape
    assert c % 2 == 0, "Block requires an even number of channels"
    mid = c // 2
    hw = h * w

    # Fold BatchNorm (eval) into the 1x1 conv: z -> scale*z + shift.
    def fold(p):
        scale = p["gamma"] / jnp.sqrt(p["var"] + BN_EPS)          # (mid,)
        w_eff = p["w"] * scale[:, None]                            # (out, in)
        b_eff = scale * (p["b"] - p["mean"]) + p["beta"]           # (mid,)
        return w_eff.astype(jnp.float32), b_eff.reshape(mid, 1).astype(jnp.float32)

    wf, bf = fold(params["F"])
    wg, bg = fold(params["G"])

    # FREE reshape (no transpose, no HBM copy): split channels into halves, fuse H*W.
    x4 = x_nchw.reshape(n, 2, mid, hw)

    t_hw = _pick_tile_hw(hw, mid, n, tile_vmem_budget_bytes)
    grid = (n, pl.cdiv(hw, t_hw))   # partial tail block handled by Pallas (no pad/slice)

    # Honest VMEM accounting (per grid step), with 2x headroom; capped at 32 MiB so it
    # raises v5e's 16 MiB scoped default without exceeding v6e/v7x scoped defaults.
    sub = ((mid + 7) // 8) * 8
    lane_mid = pl.cdiv(mid, 128) * 128
    half_tile_bytes = sub * t_hw * 4
    weight_bytes_per_branch = (sub * lane_mid + sub * 128) * 4     # padded W + bias
    footprint = (
        2 * 2 * half_tile_bytes            # double-buffered input tile (2 halves)
        + 2 * 2 * half_tile_bytes          # double-buffered output tile (2 halves)
        + 4 * half_tile_bytes              # in-kernel f32 temporaries (f, y1, g, y2)
        + 2 * 2 * weight_bytes_per_branch  # double-buffered folded weights, 2 branches
    )
    vmem_limit = int(min(32 * 1024 * 1024, max(8 * 1024 * 1024, 2 * footprint)))

    # Static (trace-time) switch: bf16 matmul operands only pay off for large mid.
    use_bf16_matmul = mid >= 256
    kernel = functools.partial(_block_kernel, use_bf16_matmul=use_bf16_matmul)

    out4 = pl.pallas_call(
        kernel,
        out_shape=jax.ShapeDtypeStruct((n, 2, mid, hw), x_nchw.dtype),
        grid_spec=pltpu.PrefetchScalarGridSpec(
            num_scalar_prefetch=0,
            grid=grid,
            in_specs=[
                pl.BlockSpec((1, 2, mid, t_hw), lambda b, j: (b, 0, 0, j)),  # x tile
                pl.BlockSpec((mid, mid), lambda b, j: (0, 0)),               # WF (BN-folded)
                pl.BlockSpec((mid, 1), lambda b, j: (0, 0)),                 # bF (BN-folded)
                pl.BlockSpec((mid, mid), lambda b, j: (0, 0)),               # WG (BN-folded)
                pl.BlockSpec((mid, 1), lambda b, j: (0, 0)),                 # bG (BN-folded)
            ],
            out_specs=pl.BlockSpec((1, 2, mid, t_hw), lambda b, j: (b, 0, 0, j)),
        ),
        # input_output_aliases intentionally NOT used: caller's x is not donated, so
        # aliasing would force a defensive full-tensor copy (extra HBM traffic).
        compiler_params=pltpu.CompilerParams(
            dimension_semantics=("parallel", "parallel"),
            vmem_limit_bytes=vmem_limit,
        ),
    )(x4, wf, bf, wg, bg)

    return out4.reshape(n, c, h, w)   # FREE reshape back to NCHW


def block_forward_ref(x_nchw, params):
    """Pure-JAX NCHW reference mirroring the PyTorch forward (reverse=False)."""
    c = x_nchw.shape[1]
    mid = c // 2

    def branch(p, inp):  # inp: (N, mid, H, W)
        z = jnp.einsum("oi,nihw->nohw", p["w"], inp) + p["b"][None, :, None, None]
        scale = p["gamma"] / jnp.sqrt(p["var"] + BN_EPS)
        z = scale[None, :, None, None] * (z - p["mean"][None, :, None, None]) \
            + p["beta"][None, :, None, None]
        return _leaky_relu(z)

    x1, x2 = x_nchw[:, :mid], x_nchw[:, mid:]
    y1 = x1 + branch(params["F"], x2)
    y2 = x2 + branch(params["G"], y1)
    return jnp.concatenate([y1, y2], axis=1)


def make_params(key, in_channels):
    mid = in_channels // 2
    ks = jax.random.split(key, 8)

    def branch_params(kw, kb, kg, kbeta):
        return {
            "w": jax.random.normal(kw, (mid, mid), jnp.float32) * 0.2,   # Conv2d 1x1 weight (out,in)
            "b": jax.random.normal(kb, (mid,), jnp.float32) * 0.1,       # Conv2d bias
            "gamma": 1.0 + 0.1 * jax.random.normal(kg, (mid,), jnp.float32),
            "beta": 0.1 * jax.random.normal(kbeta, (mid,), jnp.float32),
            "mean": jnp.linspace(-0.2, 0.2, mid, dtype=jnp.float32),     # running_mean
            "var": jnp.linspace(0.8, 1.2, mid, dtype=jnp.float32),       # running_var
        }

    return {
        "F": branch_params(ks[0], ks[1], ks[2], ks[3]),
        "G": branch_params(ks[4], ks[5], ks[6], ks[7]),
    }


if __name__ == "__main__":
    key = jax.random.PRNGKey(0)
    k_x, k_p = jax.random.split(key)

    N, C, H, W = 2, 8, 16, 16  # in_channels must be even
    x = jax.random.normal(k_x, (N, C, H, W), jnp.float32)
    params = make_params(k_p, C)

    fwd = jax.jit(block_forward_pallas)
    out = fwd(x, params)
    out = jax.block_until_ready(out)

    ref = block_forward_ref(x, params)
    assert out.shape == (N, C, H, W)
    assert jnp.allclose(out, ref, atol=1e-5, rtol=1e-5), "mismatch vs reference"

    print("KERNEL_OK")
</pallas_src>

<mosaic_0001>
module attributes {stable_mosaic.version = 11 : i64} {
  func.func @_block_kernel(%arg0: i32, %arg1: i32, %arg2: memref<1x2x4x256xf32, #tpu.memory_space<vmem>>, %arg3: memref<4x4xf32, #tpu.memory_space<vmem>>, %arg4: memref<4x1xf32, #tpu.memory_space<vmem>>, %arg5: memref<4x4xf32, #tpu.memory_space<vmem>>, %arg6: memref<4x1xf32, #tpu.memory_space<vmem>>, %arg7: memref<1x2x4x256xf32, #tpu.memory_space<vmem>>) attributes {dimension_semantics = [#tpu.dimension_semantics<parallel>, #tpu.dimension_semantics<parallel>], iteration_bounds = array<i64: 2, 1>, scalar_prefetch = 0 : i64, scratch_operands = 0 : i64, tpu.core_type = #tpu.core_type<tc>, window_params = [{transform_indices = @transform_0, window_bounds = array<i64: 1, 2, 4, 256>}, {pipeline_mode = #tpu.pipeline_mode<synchronous>, transform_indices = @transform_1, window_bounds = array<i64: 4, 4>}, {pipeline_mode = #tpu.pipeline_mode<synchronous>, transform_indices = @transform_2, window_bounds = array<i64: 4, 1>}, {pipeline_mode = #tpu.pipeline_mode<synchronous>, transform_indices = @transform_3, window_bounds = array<i64: 4, 4>}, {pipeline_mode = #tpu.pipeline_mode<synchronous>, transform_indices = @transform_4, window_bounds = array<i64: 4, 1>}, {transform_indices = @transform_5, window_bounds = array<i64: 1, 2, 4, 256>}]} {
    %c0 = arith.constant 0 : index
    %c0_0 = arith.constant 0 : index
    %c0_1 = arith.constant 0 : index
    %c0_2 = arith.constant 0 : index
    %0 = vector.load %arg2[%c0, %c0_0, %c0_1, %c0_2] : memref<1x2x4x256xf32, #tpu.memory_space<vmem>>, vector<1x1x4x256xf32>
    %1 = vector.shape_cast %0 : vector<1x1x4x256xf32> to vector<4x256xf32>
    %c0_3 = arith.constant 0 : index
    %c1 = arith.constant 1 : index
    %c0_4 = arith.constant 0 : index
    %c0_5 = arith.constant 0 : index
    %2 = vector.load %arg2[%c0_3, %c1, %c0_4, %c0_5] : memref<1x2x4x256xf32, #tpu.memory_space<vmem>>, vector<1x1x4x256xf32>
    %3 = vector.shape_cast %2 : vector<1x1x4x256xf32> to vector<4x256xf32>
    %c0_6 = arith.constant 0 : index
    %c0_7 = arith.constant 0 : index
    %4 = vector.load %arg3[%c0_6, %c0_7] : memref<4x4xf32, #tpu.memory_space<vmem>>, vector<4x4xf32>
    %cst = arith.constant dense<0.000000e+00> : vector<4x256xf32>
    %5 = tpu.matmul %4, %3, %cst {dimension_numbers = #tpu.dot_dimension_numbers<[1], [0], [0], [1], [0, 0, 1, 1], [], []>} : vector<4x4xf32>, vector<4x256xf32>, vector<4x256xf32> -> vector<4x256xf32>
    %c0_8 = arith.constant 0 : index
    %c0_9 = arith.constant 0 : index
    %6 = vector.load %arg4[%c0_8, %c0_9] : memref<4x1xf32, #tpu.memory_space<vmem>>, vector<4x1xf32>
    %7 = vector.broadcast %6 : vector<4x1xf32> to vector<4x256xf32>
    %8 = arith.addf %5, %7 : vector<4x256xf32>
    %cst_10 = arith.constant 0.000000e+00 : f32
    %9 = vector.broadcast %cst_10 : f32 to vector<4x256xf32>
    %10 = arith.cmpf oge, %8, %9 : vector<4x256xf32>
    %cst_11 = arith.constant 0.00999999977 : f32
    %11 = vector.broadcast %cst_11 : f32 to vector<4x256xf32>
    %12 = arith.mulf %11, %8 : vector<4x256xf32>
    %13 = arith.select %10, %8, %12 : vector<4x256xi1>, vector<4x256xf32>
    %14 = arith.addf %1, %13 : vector<4x256xf32>
    %c0_12 = arith.constant 0 : index
    %c0_13 = arith.constant 0 : index
    %15 = vector.load %arg5[%c0_12, %c0_13] : memref<4x4xf32, #tpu.memory_space<vmem>>, vector<4x4xf32>
    %cst_14 = arith.constant dense<0.000000e+00> : vector<4x256xf32>
    %16 = tpu.matmul %15, %14, %cst_14 {dimension_numbers = #tpu.dot_dimension_numbers<[1], [0], [0], [1], [0, 0, 1, 1], [], []>} : vector<4x4xf32>, vector<4x256xf32>, vector<4x256xf32> -> vector<4x256xf32>
    %c0_15 = arith.constant 0 : index
    %c0_16 = arith.constant 0 : index
    %17 = vector.load %arg6[%c0_15, %c0_16] : memref<4x1xf32, #tpu.memory_space<vmem>>, vector<4x1xf32>
    %18 = vector.broadcast %17 : vector<4x1xf32> to vector<4x256xf32>
    %19 = arith.addf %16, %18 : vector<4x256xf32>
    %cst_17 = arith.constant 0.000000e+00 : f32
    %20 = vector.broadcast %cst_17 : f32 to vector<4x256xf32>
    %21 = arith.cmpf oge, %19, %20 : vector<4x256xf32>
    %cst_18 = arith.constant 0.00999999977 : f32
    %22 = vector.broadcast %cst_18 : f32 to vector<4x256xf32>
    %23 = arith.mulf %22, %19 : vector<4x256xf32>
    %24 = arith.select %21, %19, %23 : vector<4x256xi1>, vector<4x256xf32>
    %25 = arith.addf %3, %24 : vector<4x256xf32>
    %c0_19 = arith.constant 0 : index
    %c0_20 = arith.constant 0 : index
    %c0_21 = arith.constant 0 : index
    %c0_22 = arith.constant 0 : index
    %26 = vector.load %arg7[%c0_19, %c0_20, %c0_21, %c0_22] : memref<1x2x4x256xf32, #tpu.memory_space<vmem>>, vector<1x1x4x256xf32>
    %27 = vector.shape_cast %26 : vector<1x1x4x256xf32> to vector<4x256xf32>
    %28 = vector.shape_cast %14 : vector<4x256xf32> to vector<1x1x4x256xf32>
    tpu.vector_store %arg7[%c0_19, %c0_20, %c0_21, %c0_22], %28 {strides = array<i32>} : memref<1x2x4x256xf32, #tpu.memory_space<vmem>>, vector<1x1x4x256xf32>,
    %c0_23 = arith.constant 0 : index
    %c1_24 = arith.constant 1 : index
    %c0_25 = arith.constant 0 : index
    %c0_26 = arith.constant 0 : index
    %29 = vector.load %arg7[%c0_23, %c1_24, %c0_25, %c0_26] : memref<1x2x4x256xf32, #tpu.memory_space<vmem>>, vector<1x1x4x256xf32>
    %30 = vector.shape_cast %29 : vector<1x1x4x256xf32> to vector<4x256xf32>
    %31 = vector.shape_cast %25 : vector<4x256xf32> to vector<1x1x4x256xf32>
    tpu.vector_store %arg7[%c0_23, %c1_24, %c0_25, %c0_26], %31 {strides = array<i32>} : memref<1x2x4x256xf32, #tpu.memory_space<vmem>>, vector<1x1x4x256xf32>,
    return
  }
  func.func @transform_0(%arg0: i32, %arg1: i32) -> (i32, i32, i32, i32) {
    %c0_i32 = arith.constant 0 : i32
    %c0_i32_0 = arith.constant 0 : i32
    %c0_i32_1 = arith.constant 0 : i32
    return %arg0, %c0_i32, %c0_i32_0, %arg1 : i32, i32, i32, i32
  }
  func.func @transform_1(%arg0: i32, %arg1: i32) -> (i32, i32) {
    %c0_i32 = arith.constant 0 : i32
    %c0_i32_0 = arith.constant 0 : i32
    %c0_i32_1 = arith.constant 0 : i32
    return %c0_i32, %c0_i32_0 : i32, i32
  }
  func.func @transform_2(%arg0: i32, %arg1: i32) -> (i32, i32) {
    %c0_i32 = arith.constant 0 : i32
    %c0_i32_0 = arith.constant 0 : i32
    %c0_i32_1 = arith.constant 0 : i32
    return %c0_i32, %c0_i32_0 : i32, i32
  }
  func.func @transform_3(%arg0: i32, %arg1: i32) -> (i32, i32) {
    %c0_i32 = arith.constant 0 : i32
    %c0_i32_0 = arith.constant 0 : i32
    %c0_i32_1 = arith.constant 0 : i32
    return %c0_i32, %c0_i32_0 : i32, i32
  }
  func.func @transform_4(%arg0: i32, %arg1: i32) -> (i32, i32) {
    %c0_i32 = arith.constant 0 : i32
    %c0_i32_0 = arith.constant 0 : i32
    %c0_i32_1 = arith.constant 0 : i32
    return %c0_i32, %c0_i32_0 : i32, i32
  }
  func.func @transform_5(%arg0: i32, %arg1: i32) -> (i32, i32, i32, i32) {
    %c0_i32 = arith.constant 0 : i32
    %c0_i32_0 = arith.constant 0 : i32
    %c0_i32_1 = arith.constant 0 : i32
    return %arg0, %c0_i32, %c0_i32_0, %arg1 : i32, i32, i32, i32
  }
}

</mosaic_0001>

<bundles_post_ra>
// kernel: block_forward_pallas.1
= control target key start
LH: loop header
LB: loop body
LE: loop exit
PB: predicated region body
PF: predicated region fallthrough
CT: control target
= control target key end

     0   :  { %s660_s18 = smov 0   ;;  %s662_s19 = smov 0   ;;  %s714_s0 = inlined_call_operand.vmem [shape: f32[2,2,4,256], index: 0, kind: input, shape index: {}]   ;;  %s715_s1 = inlined_call_operand.vmem [shape: f32[4,4], index: 1, kind: input, shape index: {}]   ;;  %s716_s2 = inlined_call_operand.vmem [shape: f32[4,1], index: 2, kind: input, shape index: {}]   ;;  %s717_s3 = inlined_call_operand.vmem [shape: f32[4,4], index: 3, kind: input, shape index: {}]   ;;  %s718_s4 = inlined_call_operand.vmem [shape: f32[4,1], index: 4, kind: input, shape index: {}]   ;;  %s719_s5 = inlined_call_operand.vmem [shape: f32[2,2,4,256], index: 5, kind: output, shape index: {}]  }
   0x1   :  { %s664_s20 = smov 0  }
   0x2 LB: > { %s27_s21 = sadd.s32 1, %s622_s19  ;;  %p559_p0 = scmp.ge.s32.totalorder %s626_s20, 1  ;;  %s626_s20 = sphi %s664_s20, %s15_s20   ;;  %s622_s19 = sphi %s662_s19, %s721_s19   ;;  %s618_s18 = sphi %s660_s18, %s720_s18  }
   0x3   : > { %p29_p1 = scmp.ge.s32.totalorder %s27_s21, 2  ;;  %p208_p2 = scmp.lt.s32.totalorder %s626_s20, 3 }
   0x5   : > { %s723_s21 = smov (%p29_p1, %s27_s21), 0  ;;  %p209_p3 = pnand %p559_p0, %p208_p2 }
   0x6   : > { %p245_p4 = scmp.lt.s32.totalorder (!%p209_p3), %s618_s18, 1 }
   0x7   : > { %212 = sbr.rel (%p209_p3) target bundleno = 433 (0x1b1), region = 40 }
   0xc   : > { %v628_v0 = vmov 0.0   ;;  %v268_v1 = vld [vmem:[%s716_s2] sm:$0xf]  ;;  %s725_s18 = smov (!%p245_p4, %s618_s18), 1  ;;  %v629_v2 = vmov 0   ;;  %vm280_vm0 = vcmask 1043456  }
   0xd   : > { %349 = vmatprep.mubr.f32.mxu0 %v628_v0  ;;  %447 = vmatprep.mubr.f32.mxu1 %v628_v0  ;;  %s574_s24 = sshll.u32 %s725_s18, 4  ;;  %v368_v3 = vld [vmem:[%s718_s4] sm:$0xf]  ;;  %vm276_vm1 = vcmask 31744  }
   0xe   : > { %602 = vset.pattern.permute.xlu0 %v629_v2  ;;  %s252_s29 = scalar_lea.vmem %s714_s0, %s574_s24  ;;  %v267_v6 = vld [vmem:[%s715_s1] sm:$0xf]  ;;  %s262_s9 = scalar_lea.vmem %s719_s5, %s574_s24 }
   0xf   : > { %271 = vperm.xlu0 %602, %v268_v1   ;;  %v564_v4 = vld [vmem:[%s252_s29 + $0x8] sm:$0xff]  ;;  %v264_v14 = vld [vmem:[%s252_s29] sm:$0xff] }
  0x10   : > { %v275_v5 = vcombine.high %v564_v4, %v564_v4  ;;  %v367_v20 = vld [vmem:[%s717_s3] sm:$0xf] }
  0x12   : > { %565 = vmatprep.subr.msk.mxu0 %vm280_vm0, %v275_v5 }
  0x13   : > { %371 = vperm.xlu0 %602, %v368_v3   ;;  %566 = vmatpush1.msk.msra.mxu0 %vm280_vm0, %v564_v4 }
  0x14   : > { %567 = vmatmul.mubr.msk.f32.vlgmr.msra.gmra.mxu0 %vm276_vm1, %v267_v6 }
  0x8a   : > { %v272_v7 = vpop.permute.xlu0 %271 }
  0x8e   : > { %v372_v21 = vpop.permute.xlu0 %371 }
  0xd4   : > { %v351_v8 = vpop.f32.mrf.mxu0 }
  0xd5   : > { %v352_v9 = vadd.f32 %v351_v8, %v272_v7 }
  0xd6   : > { %v353_v10 = vpop.f32.mrf.mxu0 }
  0xd7   : > { %v358_v11 = vmul.f32 0.01, %v352_v9  ;;  %v354_v12 = vadd.f32 %v353_v10, %v272_v7  ;;  %vm356_vm2 = vcmp.ge.f32.partialorder %v352_v9, 0.0 }
  0xd9   : > { %vm357_vm3 = vcmp.ge.f32.partialorder %v354_v12, 0.0  ;;  %v359_v13 = vmul.f32 0.01, %v354_v12  ;;  %v360_v15 = vsel %vm356_vm2, %v352_v9, %v358_v11 }
  0xdb   : > { %v361_v16 = vsel %vm357_vm3, %v354_v12, %v359_v13 }
  0xdc   : > { %v364_v17 = vcombine.low %v360_v15, %v361_v16 }
  0xde   : > { %v366_v18 = vadd.f32 %v364_v17, %v264_v14 }
  0xe0   : > { %v375_v19 = vcombine.high %v366_v18, %v366_v18  ;;  %465 = vst [vmem:[%s262_s9] sm:$0xff] %v366_v18 }
  0xe2   : > { %568 = vmatprep.subr.msk.mxu1 %vm280_vm0, %v375_v19 }
  0xe3   : > { %569 = vmatpush1.msk.msra.mxu1 %vm280_vm0, %v366_v18 }
  0xe4   : > { %570 = vmatmul.mubr.msk.f32.vlgmr.msra.gmra.mxu1 %vm276_vm1, %v367_v20 }
 0x1a4   : > { %v449_v22 = vpop.f32.mrf.mxu1 }
 0x1a5   : > { %v450_v23 = vadd.f32 %v449_v22, %v372_v21 }
 0x1a6   : > { %v451_v24 = vpop.f32.mrf.mxu1 }
 0x1a7   : > { %v456_v25 = vmul.f32 0.01, %v450_v23  ;;  %v452_v26 = vadd.f32 %v451_v24, %v372_v21  ;;  %vm454_vm4 = vcmp.ge.f32.partialorder %v450_v23, 0.0 }
 0x1a9   : > { %vm455_vm5 = vcmp.ge.f32.partialorder %v452_v26, 0.0  ;;  %v457_v27 = vmul.f32 0.01, %v452_v26  ;;  %v458_v28 = vsel %vm454_vm4, %v450_v23, %v456_v25 }
 0x1ab   : > { %v459_v29 = vsel %vm455_vm5, %v452_v26, %v457_v27 }
 0x1ac   : > { %v462_v30 = vcombine.low %v458_v28, %v459_v29 }
 0x1ae   : > { %v464_v31 = vadd.f32 %v564_v4, %v462_v30 }
 0x1b0   : > { %571 = vst [vmem:[%s262_s9 + $0x8] sm:$0xff] %v464_v31 }
 0x1b1 PF: > { %s15_s20 = sadd.s32 1, %s626_s20   ;;  %s720_s18 = smov %s622_s19 }
 0x1b2   : > { %p12_p5 = scmp.ge.s32.totalorder %s15_s20, 4   ;;  %s721_s19 = smov %s723_s21 }
 0x1b4   :  { %14 = sbr.rel (!%p12_p5) target bundleno = 2 (0x2), region = 72 }

</bundles_post_ra>
